<compile_context>
chip_gen: v7x
topology: tpu7x:2x2x1
jax: 0.10.0
libtpu: 0.0.40
codegen_flags: <defaults>
</compile_context>

<pallas_src>
import jax
import jax.numpy as jnp
from jax.experimental import pallas as pl
from jax.experimental.pallas import tpu as pltpu


def _box_kernel(x_ref, p_ref, wl_ref, wu_ref, bl_ref, bu_ref, o_ref):
    """One (tb, tn) output block.

    x_ref:  (tb, tn)   input to project
    p_ref:  (tb, P)    parameters
    wl_ref: (P, tn)    lower-bound weights   bl_ref: (1, tn) lower-bound bias
    wu_ref: (P, tn)    upper-bound weights   bu_ref: (1, tn) upper-bound bias
    """
    p = p_ref[...]
    u_b = jnp.dot(p, wu_ref[...], preferred_element_type=jnp.float32) + bu_ref[...]
    t = jnp.minimum(x_ref[...], u_b)          # relu(u_b - x) folded in
    l_b = jnp.dot(p, wl_ref[...], preferred_element_type=jnp.float32) + bl_ref[...]
    # Equivalent to l_b + relu(u_b - l_b - relu(u_b - x)), incl. l_b > u_b case.
    o_ref[...] = jnp.maximum(l_b, t)


def _vmem_estimate(tb, tn, P):
    """Rough per-step VMEM bytes (double-buffered streams + in-flight temps)."""
    f32 = 4
    stream = 2 * (tb * tn) * f32 * 2           # x + out blocks, double-buffered
    parms = tb * P * f32 * 2
    weights = 2 * P * tn * f32 * 2             # W_l + W_u, double-buffered
    biases = 2 * tn * f32 * 2
    temps = 3 * tb * tn * f32                  # u_b / t / l_b values in flight
    return stream + parms + weights + biases + temps


def _pick_tiles(B, P, N, tile_b, tile_n, budget_bytes):
    tile_b = max(8, (tile_b // 8) * 8)
    # Batch tile: full B when it fits one block (block dim == array dim is
    # always legal), otherwise a multiple of 8 with a masked partial last block.
    tb = B if B <= tile_b else tile_b
    # N tile: multiple of 128, or full N when N is not lane-aligned.
    if N % 128 != 0:
        tn = N
    else:
        tn = min(N, max(128, (tile_n // 128) * 128))
    # Shrink tn first (keeps the weight block small for large P), then tb.
    while _vmem_estimate(tb, tn, P) > budget_bytes and N % 128 == 0 and tn > 128:
        tn = max(128, (tn // 2 // 128) * 128)
    while _vmem_estimate(tb, tn, P) > budget_bytes and tb > 8:
        new_tb = max(8, (tb // 2 // 8) * 8)
        if new_tb == tb:
            break
        tb = new_tb
    return tb, tn


def box_constraint(x, parms, w_l, b_l, w_u, b_u, *, tile_b=512, tile_n=2048):
    """Fused BoxConstraint forward.

    x:        (B, N) float32
    parms:    (B, P) float32
    w_l, w_u: (P, N) float32
    b_l, b_u: (1, N) float32
    returns   (B, N) float32
    """
    B, N = x.shape
    _, P = parms.shape

    budget = 40 * 1024 * 1024
    tb, tn = _pick_tiles(B, P, N, tile_b, tile_n, budget)
    nb = pl.cdiv(B, tb)
    nt = pl.cdiv(N, tn)

    if nt == 1:
        # Common case: one N tile.  1-D grid over batch so the parallel axis
        # that the v7x megacore splits always has the full batch extent.
        grid = (nb,)
        x_map = lambda i: (i, 0)
        p_map = lambda i: (i, 0)
        w_map = lambda i: (0, 0)
        b_map = lambda i: (0, 0)
        o_map = lambda i: (i, 0)
        semantics = ("parallel",)
    else:
        # Batch outermost so megacore splits it even though weights re-DMA per
        # inner N step (cheap: P is small relative to the x/out streams).
        grid = (nb, nt)
        x_map = lambda i, j: (i, j)
        p_map = lambda i, j: (i, 0)
        w_map = lambda i, j: (0, j)
        b_map = lambda i, j: (0, j)
        o_map = lambda i, j: (i, j)
        semantics = ("parallel", "parallel")

    return pl.pallas_call(
        _box_kernel,
        out_shape=jax.ShapeDtypeStruct((B, N), jnp.float32),
        grid_spec=pl.GridSpec(
            grid=grid,
            in_specs=[
                pl.BlockSpec((tb, tn), x_map),   # x
                pl.BlockSpec((tb, P), p_map),    # parms
                pl.BlockSpec((P, tn), w_map),    # W_l
                pl.BlockSpec((P, tn), w_map),    # W_u
                pl.BlockSpec((1, tn), b_map),    # b_l
                pl.BlockSpec((1, tn), b_map),    # b_u
            ],
            out_specs=pl.BlockSpec((tb, tn), o_map),
        ),
        compiler_params=pltpu.CompilerParams(
            dimension_semantics=semantics,
            vmem_limit_bytes=48 * 1024 * 1024,
        ),
    )(x, parms, w_l, w_u, b_l, b_u)


def box_constraint_ref(x, parms, w_l, b_l, w_u, b_u):
    """Pure-JAX reference matching the torch forward exactly."""
    l_b = parms @ w_l + b_l
    u_b = parms @ w_u + b_u
    return l_b + jax.nn.relu(u_b - l_b - jax.nn.relu(u_b - x))


def _run_case(key, B, P, N):
    k_x, k_p, k_wl, k_wu, k_bl, k_bu = jax.random.split(key, 6)
    x = jax.random.normal(k_x, (B, N), dtype=jnp.float32) * 2.0
    parms = jax.random.normal(k_p, (B, P), dtype=jnp.float32)
    w_l = jax.random.normal(k_wl, (P, N), dtype=jnp.float32) * 0.1
    w_u = jax.random.normal(k_wu, (P, N), dtype=jnp.float32) * 0.1
    b_l = jax.random.normal(k_bl, (1, N), dtype=jnp.float32) - 1.0
    b_u = jax.random.normal(k_bu, (1, N), dtype=jnp.float32) + 1.0

    out = jax.block_until_ready(box_constraint(x, parms, w_l, b_l, w_u, b_u))
    ref = box_constraint_ref(x, parms, w_l, b_l, w_u, b_u)

    assert out.shape == (B, N) and out.dtype == jnp.float32
    assert jnp.allclose(out, ref, atol=1e-5, rtol=1e-5), (
        f"max abs err {jnp.max(jnp.abs(out - ref))} at B={B},P={P},N={N}")


if __name__ == "__main__":
    key = jax.random.PRNGKey(0)
    k0, k1 = jax.random.split(key)

    # Primary small case (batch=8, param dim=16, decision-variable dim=128).
    _run_case(k0, B=8, P=16, N=128)
    # Ragged case exercising masked partial batch blocks (B not a mult. of 8).
    _run_case(k1, B=20, P=5, N=256)

    print("KERNEL_OK")
</pallas_src>

<mosaic_0001>
module attributes {stable_mosaic.version = 11 : i64} {
  func.func @_box_kernel(%arg0: i32, %arg1: memref<8x128xf32, #tpu.memory_space<vmem>>, %arg2: memref<8x16xf32, #tpu.memory_space<vmem>>, %arg3: memref<16x128xf32, #tpu.memory_space<vmem>>, %arg4: memref<16x128xf32, #tpu.memory_space<vmem>>, %arg5: memref<1x128xf32, #tpu.memory_space<vmem>>, %arg6: memref<1x128xf32, #tpu.memory_space<vmem>>, %arg7: memref<8x128xf32, #tpu.memory_space<vmem>>) attributes {dimension_semantics = [#tpu.dimension_semantics<parallel>], iteration_bounds = array<i64: 1>, scalar_prefetch = 0 : i64, scratch_operands = 0 : i64, tpu.core_type = #tpu.core_type<tc>, window_params = [{transform_indices = @transform_0, window_bounds = array<i64: 8, 128>}, {transform_indices = @transform_1, window_bounds = array<i64: 8, 16>}, {pipeline_mode = #tpu.pipeline_mode<synchronous>, transform_indices = @transform_2, window_bounds = array<i64: 16, 128>}, {pipeline_mode = #tpu.pipeline_mode<synchronous>, transform_indices = @transform_3, window_bounds = array<i64: 16, 128>}, {pipeline_mode = #tpu.pipeline_mode<synchronous>, transform_indices = @transform_4, window_bounds = array<i64: 1, 128>}, {pipeline_mode = #tpu.pipeline_mode<synchronous>, transform_indices = @transform_5, window_bounds = array<i64: 1, 128>}, {transform_indices = @transform_6, window_bounds = array<i64: 8, 128>}]} {
    %c0 = arith.constant 0 : index
    %c0_0 = arith.constant 0 : index
    %0 = vector.load %arg2[%c0, %c0_0] : memref<8x16xf32, #tpu.memory_space<vmem>>, vector<8x16xf32>
    %c0_1 = arith.constant 0 : index
    %c0_2 = arith.constant 0 : index
    %1 = vector.load %arg4[%c0_1, %c0_2] : memref<16x128xf32, #tpu.memory_space<vmem>>, vector<16x128xf32>
    %cst = arith.constant dense<0.000000e+00> : vector<8x128xf32>
    %2 = tpu.matmul %0, %1, %cst {dimension_numbers = #tpu.dot_dimension_numbers<[1], [0], [0], [1], [0, 0, 1, 1], [], []>} : vector<8x16xf32>, vector<16x128xf32>, vector<8x128xf32> -> vector<8x128xf32>
    %c0_3 = arith.constant 0 : index
    %c0_4 = arith.constant 0 : index
    %3 = vector.load %arg6[%c0_3, %c0_4] : memref<1x128xf32, #tpu.memory_space<vmem>>, vector<1x128xf32>
    %4 = vector.broadcast %3 : vector<1x128xf32> to vector<8x128xf32>
    %5 = arith.addf %2, %4 : vector<8x128xf32>
    %c0_5 = arith.constant 0 : index
    %c0_6 = arith.constant 0 : index
    %6 = vector.load %arg1[%c0_5, %c0_6] : memref<8x128xf32, #tpu.memory_space<vmem>>, vector<8x128xf32>
    %7 = arith.minimumf %6, %5 : vector<8x128xf32>
    %c0_7 = arith.constant 0 : index
    %c0_8 = arith.constant 0 : index
    %8 = vector.load %arg3[%c0_7, %c0_8] : memref<16x128xf32, #tpu.memory_space<vmem>>, vector<16x128xf32>
    %cst_9 = arith.constant dense<0.000000e+00> : vector<8x128xf32>
    %9 = tpu.matmul %0, %8, %cst_9 {dimension_numbers = #tpu.dot_dimension_numbers<[1], [0], [0], [1], [0, 0, 1, 1], [], []>} : vector<8x16xf32>, vector<16x128xf32>, vector<8x128xf32> -> vector<8x128xf32>
    %c0_10 = arith.constant 0 : index
    %c0_11 = arith.constant 0 : index
    %10 = vector.load %arg5[%c0_10, %c0_11] : memref<1x128xf32, #tpu.memory_space<vmem>>, vector<1x128xf32>
    %11 = vector.broadcast %10 : vector<1x128xf32> to vector<8x128xf32>
    %12 = arith.addf %9, %11 : vector<8x128xf32>
    %13 = arith.maximumf %12, %7 : vector<8x128xf32>
    %c0_12 = arith.constant 0 : index
    %c0_13 = arith.constant 0 : index
    %14 = vector.load %arg7[%c0_12, %c0_13] : memref<8x128xf32, #tpu.memory_space<vmem>>, vector<8x128xf32>
    tpu.vector_store %arg7[%c0_12, %c0_13], %13 {strides = array<i32>} : memref<8x128xf32, #tpu.memory_space<vmem>>, vector<8x128xf32>,
    return
  }
  func.func @transform_0(%arg0: i32) -> (i32, i32) {
    %c0_i32 = arith.constant 0 : i32
    %c0_i32_0 = arith.constant 0 : i32
    return %arg0, %c0_i32 : i32, i32
  }
  func.func @transform_1(%arg0: i32) -> (i32, i32) {
    %c0_i32 = arith.constant 0 : i32
    %c0_i32_0 = arith.constant 0 : i32
    return %arg0, %c0_i32 : i32, i32
  }
  func.func @transform_2(%arg0: i32) -> (i32, i32) {
    %c0_i32 = arith.constant 0 : i32
    %c0_i32_0 = arith.constant 0 : i32
    %c0_i32_1 = arith.constant 0 : i32
    return %c0_i32, %c0_i32_0 : i32, i32
  }
  func.func @transform_3(%arg0: i32) -> (i32, i32) {
    %c0_i32 = arith.constant 0 : i32
    %c0_i32_0 = arith.constant 0 : i32
    %c0_i32_1 = arith.constant 0 : i32
    return %c0_i32, %c0_i32_0 : i32, i32
  }
  func.func @transform_4(%arg0: i32) -> (i32, i32) {
    %c0_i32 = arith.constant 0 : i32
    %c0_i32_0 = arith.constant 0 : i32
    %c0_i32_1 = arith.constant 0 : i32
    return %c0_i32, %c0_i32_0 : i32, i32
  }
  func.func @transform_5(%arg0: i32) -> (i32, i32) {
    %c0_i32 = arith.constant 0 : i32
    %c0_i32_0 = arith.constant 0 : i32
    %c0_i32_1 = arith.constant 0 : i32
    return %c0_i32, %c0_i32_0 : i32, i32
  }
  func.func @transform_6(%arg0: i32) -> (i32, i32) {
    %c0_i32 = arith.constant 0 : i32
    %c0_i32_0 = arith.constant 0 : i32
    return %arg0, %c0_i32 : i32, i32
  }
}

</mosaic_0001>

<bundles_post_ra>
// kernel: tpu_custom_call.1
= control target key start
LH: loop header
LB: loop body
LE: loop exit
PB: predicated region body
PF: predicated region fallthrough
CT: control target
= control target key end

     0   :  { %11 = vsyncpa [#allocation3], 0  ;;  %s528_s0 = inlined_call_operand.hbm [shape: f32[8,128], index: 0, kind: input, shape index: {}]   ;;  %s529_s1 = inlined_call_operand.hbm [shape: f32[8,16], index: 1, kind: input, shape index: {}]   ;;  %s530_s2 = inlined_call_operand.hbm [shape: f32[16,128], index: 2, kind: input, shape index: {}]   ;;  %s531_s3 = inlined_call_operand.hbm [shape: f32[16,128], index: 3, kind: input, shape index: {}]   ;;  %s532_s4 = inlined_call_operand.vmem [shape: f32[1,128], index: 4, kind: input, shape index: {}]   ;;  %s533_s5 = inlined_call_operand.vmem [shape: f32[1,128], index: 5, kind: input, shape index: {}]   ;;  %s534_s6 = inlined_call_operand.hbm [shape: f32[8,128], index: 6, kind: output, shape index: {}]  }
   0x1   :  { %12 = vsyncpa [#allocation6], 0 }
   0x2   :  { %13 = vsyncpa [#allocation9], 0 }
   0x3   :  { %14 = vsyncpa [#allocation4], 0  ;;  %s417_s21 = smov [#allocation5]   ;;  %s418_s23 = smov [#allocation2]  }
   0x4   :  { %s31_s22 = sshll.u32 %s417_s21, 4  ;;  %s21_s24 = sshll.u32 %s418_s23, 4  ;;  %s32_s22 = int_to_ptr.vmem [resolvable:$true] %s31_s22  ;;  %s22_s24 = int_to_ptr.vmem [resolvable:$true] %s21_s24 }
   0x5   :  { %s299_s27 = scalar_lea.hbm %s529_s1, 128 }
   0x6   :  { %p300_p0 = scmp.ne.s32.totalorder %s529_s1, %s299_s27  ;;  %p303_p1 = scmp.lt.u32.totalorder %s299_s27, %s529_s1 }
   0x8   :  { %p305_p2 = pnand %p303_p1, %p300_p0 }
   0xa   :  { %308 = shalt.err (!%p305_p2)
}
   0xb   :  { %s309_s8 = scalar_lea.vmem %s32_s22, 128  ;;  %p314_p4 = scmp.lt.s32.totalorder %s32_s22, %s32_s22 }
   0xc   :  { %p310_p3 = scmp.ne.s32.totalorder %s32_s22, %s309_s8  ;;  %p315_p5 = scmp.lt.s32.totalorder %s309_s8, %s309_s8 }
   0xe   :  { %p316_p6 = por %p315_p5, %p314_p4 }
  0x10   :  { %p317_p7 = pnand %p316_p6, %p310_p3 }
  0x12   :  { %320 = shalt.err (!%p317_p7)
}
  0x13   :  { %34 = dma.hbm_to_vmem [thread:$0]  %s529_s1, 128, %s32_s22, [#allocation6]  }
  0x14   :  { %s321_s13 = scalar_lea.hbm %s528_s0, 128 }
  0x15   :  { %p322_p8 = scmp.ne.s32.totalorder %s528_s0, %s321_s13  ;;  %p325_p9 = scmp.lt.u32.totalorder %s321_s13, %s528_s0 }
  0x17   :  { %p327_p10 = pnand %p325_p9, %p322_p8 }
  0x19   :  { %330 = shalt.err (!%p327_p10)
}
  0x1a   :  { %s331_s18 = scalar_lea.vmem %s22_s24, 128  ;;  %p336_p12 = scmp.lt.s32.totalorder %s22_s24, %s22_s24 }
  0x1b   :  { %p332_p11 = scmp.ne.s32.totalorder %s22_s24, %s331_s18  ;;  %p337_p13 = scmp.lt.s32.totalorder %s331_s18, %s331_s18 }
  0x1d   :  { %p338_p0 = por %p337_p13, %p336_p12 }
  0x1f   :  { %p339_p1 = pnand %p338_p0, %p332_p11 }
  0x21   :  { %342 = shalt.err (!%p339_p1)
}
  0x22   :  { %24 = dma.hbm_to_vmem [thread:$0]  %s528_s0, 128, %s22_s24, [#allocation3]  }
  0x23   :  { %s419_s20 = smov [#allocation7]   ;;  %s343_s25 = scalar_lea.hbm %s530_s2, 256 }
  0x24   :  { %s40_s21 = sshll.u32 %s419_s20, 4  ;;  %p344_p2 = scmp.ne.s32.totalorder %s530_s2, %s343_s25  ;;  %s41_s21 = int_to_ptr.vmem [resolvable:$true] %s40_s21 }
  0x25   :  { %p347_p3 = scmp.lt.u32.totalorder %s343_s25, %s530_s2 }
  0x27   :  { %p349_p4 = pnand %p347_p3, %p344_p2 }
  0x29   :  { %352 = shalt.err (!%p349_p4)
}
  0x2a   :  { %s353_s30 = scalar_lea.vmem %s41_s21, 256  ;;  %p358_p6 = scmp.lt.s32.totalorder %s41_s21, %s41_s21 }
  0x2b   :  { %p354_p5 = scmp.ne.s32.totalorder %s41_s21, %s353_s30  ;;  %p359_p7 = scmp.lt.s32.totalorder %s353_s30, %s353_s30 }
  0x2d   :  { %p360_p8 = por %p359_p7, %p358_p6 }
  0x2f   :  { %p361_p9 = pnand %p360_p8, %p354_p5 }
  0x31   :  { %364 = shalt.err (!%p361_p9)
}
  0x32   :  { %s420_s0 = smov 128   ;;  %s421_s24 = smov 8  }
  0x33   :  { %46 = dma.hbm_to_vmem [thread:$0]  %s530_s2, 256, %s41_s21, [#allocation6], %s420_s0, %s420_s0, %s421_s24  }
  0x34   :  { %s422_s9 = smov [#allocation8]   ;;  %s365_s13 = scalar_lea.hbm %s531_s3, 256 }
  0x35   :  { %s52_s10 = sshll.u32 %s422_s9, 4  ;;  %p366_p10 = scmp.ne.s32.totalorder %s531_s3, %s365_s13  ;;  %s53_s10 = int_to_ptr.vmem [resolvable:$true] %s52_s10 }
  0x36   :  { %p369_p11 = scmp.lt.u32.totalorder %s365_s13, %s531_s3 }
  0x38   :  { %p371_p12 = pnand %p369_p11, %p366_p10 }
  0x3a   :  { %374 = shalt.err (!%p371_p12)
}
  0x3b   :  { %s375_s18 = scalar_lea.vmem %s53_s10, 256  ;;  %p380_p0 = scmp.lt.s32.totalorder %s53_s10, %s53_s10 }
  0x3c   :  { %p376_p13 = scmp.ne.s32.totalorder %s53_s10, %s375_s18  ;;  %p381_p1 = scmp.lt.s32.totalorder %s375_s18, %s375_s18 }
  0x3e   :  { %p382_p2 = por %p381_p1, %p380_p0 }
  0x40   :  { %p383_p3 = pnand %p382_p2, %p376_p13 }
  0x42   :  { %386 = shalt.err (!%p383_p3)
}
  0x43   :  { %58 = dma.hbm_to_vmem [thread:$0]  %s531_s3, 256, %s53_s10, [#allocation9], %s420_s0, %s420_s0, %s421_s24  }
  0x44   :  { %409 = dma.done.wait [#allocation3], 128  }
  0x45   :  { %410 = vsyncadd [#allocation3], 4294967168 }
  0x46   :  { %411 = dma.done.wait [#allocation6], 384  }
  0x47   :  { %412 = vsyncadd [#allocation6], 4294966912 }
  0x48   :  { %413 = dma.done.wait [#allocation9], 256  }
  0x49   :  { %414 = vsyncadd [#allocation9], 4294967040  ;;  %v423_v0 = vmov 0.0|0.0   ;;  %vm424_vm0 = vmmov 0   ;;  %v425_v1 = vmov 0.0   ;;  %v76_v2 = vld [vmem:[#allocation8] sm:$0xff] }
  0x4a   :  { %283 = vmatprep.subr.bf16.mxu0 %v423_v0  ;;  %286 = vmatprep.subr.bf16.mxu1 %v423_v0  ;;  %v77_v3 = vld [vmem:[#allocation8 + $0x8] sm:$0xff]  ;;  %v161_v4 = vld [vmem:[#allocation7] sm:$0xff]  ;;  %v162_v6 = vld [vmem:[#allocation7 + $0x8] sm:$0xff]  ;;  %vm85_vm1 = vcmask 130048   ;;  %s426_s22 = smov [#allocation10]  }
  0x4b   :  { %273 = vmatprep.mubr.msk.f32.mxu0 %vm424_vm0, %v425_v1  ;;  %280 = vmatprep.mubr.msk.f32.mxu1 %vm424_vm0, %v425_v1  ;;  %v284_v5 = vpack.c.bf16 %v77_v3, %v76_v2  ;;  %v287_v7 = vpack.c.bf16 %v162_v6, %v161_v4  ;;  %v75_v8 = vld [vmem:[#allocation5] sm:$0xff]  ;;  %v259_v9 = vld [vmem:[%s533_s5] ss:$0 sm:$0xff]  ;;  %s248_s23 = sshll.u32 %s426_s22, 4  ;;  %s249_s23 = int_to_ptr.vmem [resolvable:$true] %s248_s23 }
  0x4c   :  { %v261_v10 = vld [vmem:[%s532_s4] ss:$0 sm:$0xff]  ;;  %s387_s25 = scalar_lea.vmem %s249_s23, 128  ;;  %p392_p5 = scmp.lt.s32.totalorder %s249_s23, %s249_s23 }
  0x4d   :  { %285 = vmatpush3.bf16.msra.mxu0 %v284_v5  ;;  %288 = vmatpush3.bf16.msra.mxu1 %v287_v7  ;;  %v159_v12 = vld [vmem:[#allocation2] sm:$0xff]  ;;  %p388_p4 = scmp.ne.s32.totalorder %s249_s23, %s387_s25  ;;  %p393_p6 = scmp.lt.s32.totalorder %s387_s25, %s387_s25 }
  0x4f   :  { %p394_p7 = por %p393_p6, %p392_p5 }
  0x50   :  { %274 = vmatmul.mubr.msk.f32.vlgmr.msra.gmra.mrb[0].mxu0 %vm85_vm1, %v75_v8  ;;  %281 = vmatmul.mubr.msk.f32.vlgmr.msra.gmra.mrb[0].mxu1 %vm85_vm1, %v75_v8 }
  0x51   :  { %p395_p8 = pnand %p394_p7, %p388_p4 }
 0x123   :  { %v155_v11 = vpop.f32.mrb[0].mxu0  ;;  %v236_v15 = vpop.f32.mrb[0].mxu1 }
 0x124   :  { %v156_v13 = vadd.f32 %v259_v9, %v155_v11  ;;  %v275_v14 = vpop.f32.mrb[1].mxu0  ;;  %v237_v16 = vadd.f32 %v261_v10, %v236_v15  ;;  %v282_v17 = vpop.f32.mrb[1].mxu1 }
 0x126   :  { %v160_v18 = vmin.f32 %v159_v12, %v156_v13 }
 0x128   :  { %v240_v19 = vmax.f32 %v237_v16, %v160_v18 }
 0x12a   :  { %241 = vst [vmem:[#allocation10] sm:$0xff] %v240_v19 }
 0x12b   :  { %398 = shalt.err (!%p395_p8)
}
 0x12c   :  { %s399_s26 = scalar_lea.hbm %s534_s6, 128 }
 0x12d   :  { %p400_p9 = scmp.ne.s32.totalorder %s534_s6, %s399_s26  ;;  %p403_p10 = scmp.lt.u32.totalorder %s399_s26, %s534_s6 }
 0x12f   :  { %p405_p11 = pnand %p403_p10, %p400_p9 }
 0x131   :  { %408 = shalt.err (!%p405_p11)
}
 0x132   :  { %251 = dma.vmem_to_hbm [thread:$0]  %s249_s23, 128, %s534_s6, [#allocation4]  }
 0x133   :  { %415 = dma.done.wait [#allocation4], 128  }
 0x134   :  { %416 = vsyncadd [#allocation4], 4294967168 }
 0x135   :  { %255 = vsyncpa [#allocation3], 1 }
 0x136   :  { %256 = vsyncpa [#allocation6], 1 }
 0x137   :  { %257 = vsyncpa [#allocation9], 1 }
 0x138   :  { %258 = vsyncpa [#allocation4], 1 }

</bundles_post_ra>
